<compile_context>
chip_gen: v6e
topology: v6e:2x2x1
jax: 0.10.0
libtpu: 0.0.40
codegen_flags: <defaults>
</compile_context>

<pallas_src>
import jax
import jax.numpy as jnp
from jax.experimental import pallas as pl
from jax.experimental.pallas import tpu as pltpu

D_IN, D_HID, D_OUT = 784, 256, 10
D_OUT_PAD = 128   # fc2 weight padded to one full 128-lane MXU tile (sliced in-kernel)


def simplenet_kernel(x_ref, w1_ref, b1_ref, w2_ref, b2_ref, o_ref):
    # fc1: cast the f32 x-tile to bf16 in-register, bf16 @ bf16 -> f32 accum on MXU.
    x = x_ref[...].astype(jnp.bfloat16)
    h = jnp.dot(x, w1_ref[...], preferred_element_type=jnp.float32)
    h = jnp.maximum(h + b1_ref[...], 0.0)
    # fc2: bf16 hidden @ bf16 w2 (N padded to 128 for the MXU) -> f32 accum.
    y = jnp.dot(h.astype(jnp.bfloat16), w2_ref[...], preferred_element_type=jnp.float32)
    # Keep only the 10 real logit columns; the (bt, 10) store is tiny (40 B/row).
    o_ref[...] = (y[:, :D_OUT] + b2_ref[...]).astype(o_ref.dtype)


def prepare_params(w1, b1, w2, b2):
    """One-time 'model load': cast weights to bf16 (pad fc2 N to 128); biases stay f32."""
    w1p = w1.astype(jnp.bfloat16)                                   # (784, 256) bf16
    b1p = b1.reshape(1, D_HID).astype(jnp.float32)                  # (1, 256)   f32
    w2p = jnp.zeros((D_HID, D_OUT_PAD), jnp.bfloat16).at[:, :D_OUT].set(
        w2.astype(jnp.bfloat16))                                    # (256, 128) bf16
    b2p = b2.reshape(1, D_OUT).astype(jnp.float32)                  # (1, 10)    f32
    return w1p, b1p, w2p, b2p


def _pick_batch_tile(B, max_tile=1024):
    """Large tiles amortize the ~0.35us/step pipeline overhead; aim for an even grid
    of >= 2 steps so the "parallel" batch axis shards across v7x's two TensorCores.
    bt <= 1024 keeps VMEM use (~9 MiB) under default scoped limits on v5e/v6e/v7x."""
    if B <= 8:
        return B                                   # single block == full batch
    n_pairs = pl.cdiv(B, 2 * max_tile)             # how many 2-step groups are needed
    bt = pl.cdiv(B, 2 * n_pairs)
    bt = ((bt + 7) // 8) * 8                       # sublane-align
    return min(bt, max_tile)


def _simplenet_forward(x, w1p, b1p, w2p, b2p):
    B = x.shape[0]
    bt = _pick_batch_tile(B)
    grid = (pl.cdiv(B, bt),)

    flops = 2 * B * (D_IN * D_HID + D_HID * D_OUT_PAD)
    bytes_accessed = (x.size * x.dtype.itemsize + w1p.size * 2 + w2p.size * 2
                      + b1p.size * 4 + b2p.size * 4 + B * D_OUT * 4)

    return pl.pallas_call(
        simplenet_kernel,
        out_shape=jax.ShapeDtypeStruct((B, D_OUT), jnp.float32),
        grid_spec=pl.GridSpec(
            grid=grid,
            in_specs=[
                pl.BlockSpec((bt, D_IN), lambda i: (i, 0)),          # x tile (pipelined)
                pl.BlockSpec((D_IN, D_HID), lambda i: (0, 0)),       # w1 resident
                pl.BlockSpec((1, D_HID), lambda i: (0, 0)),          # b1 resident
                pl.BlockSpec((D_HID, D_OUT_PAD), lambda i: (0, 0)),  # w2 resident
                pl.BlockSpec((1, D_OUT), lambda i: (0, 0)),          # b2 resident
            ],
            out_specs=pl.BlockSpec((bt, D_OUT), lambda i: (i, 0)),
        ),
        compiler_params=pltpu.CompilerParams(
            dimension_semantics=("parallel",),   # batch axis -> both TCs on v7x
        ),
        cost_estimate=pl.CostEstimate(
            flops=flops, transcendentals=0, bytes_accessed=bytes_accessed),
    )(x, w1p, b1p, w2p, b2p)


simplenet_forward = jax.jit(_simplenet_forward)


if __name__ == "__main__":
    key = jax.random.PRNGKey(0)
    k_x, k_w1, k_b1, k_w2, k_b2 = jax.random.split(key, 5)

    B = 32  # small batch -> two 16-row grid steps (exercises pipelining + resident weights)

    x = jax.random.normal(k_x, (B, D_IN), dtype=jnp.float32)

    # Deterministic "PyTorch-like" init: uniform(-1/sqrt(fan_in), 1/sqrt(fan_in)).
    bound1 = 1.0 / (D_IN ** 0.5)
    w1 = jax.random.uniform(k_w1, (D_IN, D_HID), jnp.float32, -bound1, bound1)
    b1 = jax.random.uniform(k_b1, (D_HID,), jnp.float32, -bound1, bound1)
    bound2 = 1.0 / (D_HID ** 0.5)
    w2 = jax.random.uniform(k_w2, (D_IN if False else D_HID, D_OUT), jnp.float32, -bound2, bound2)
    b2 = jax.random.uniform(k_b2, (D_OUT,), jnp.float32, -bound2, bound2)

    params = prepare_params(w1, b1, w2, b2)
    out = simplenet_forward(x, *params)
    jax.block_until_ready(out)

    # Plain-JAX reference computing exactly the kernel's math (bf16 operands, f32 accum).
    x_r = x.astype(jnp.bfloat16).astype(jnp.float32)
    w1_r = w1.astype(jnp.bfloat16).astype(jnp.float32)
    w2_r = w2.astype(jnp.bfloat16).astype(jnp.float32)
    h_r = jnp.maximum(x_r @ w1_r + b1.reshape(1, -1), 0.0)
    ref = h_r.astype(jnp.bfloat16).astype(jnp.float32) @ w2_r + b2.reshape(1, -1)

    assert out.shape == (B, D_OUT)
    assert jnp.allclose(out, ref, atol=1e-2, rtol=1e-2)

    print("KERNEL_OK")
</pallas_src>

<mosaic_0001>
module attributes {stable_mosaic.version = 11 : i64} {
  func.func @simplenet_kernel(%arg0: i32, %arg1: memref<16x784xf32, #tpu.memory_space<vmem>>, %arg2: memref<784x256xbf16, #tpu.memory_space<vmem>>, %arg3: memref<1x256xf32, #tpu.memory_space<vmem>>, %arg4: memref<256x128xbf16, #tpu.memory_space<vmem>>, %arg5: memref<1x10xf32, #tpu.memory_space<vmem>>, %arg6: memref<16x10xf32, #tpu.memory_space<vmem>>) attributes {dimension_semantics = [#tpu.dimension_semantics<parallel>], iteration_bounds = array<i64: 2>, scalar_prefetch = 0 : i64, scratch_operands = 0 : i64, tpu.core_type = #tpu.core_type<tc>, window_params = [{transform_indices = @transform_0, window_bounds = array<i64: 16, 784>}, {pipeline_mode = #tpu.pipeline_mode<synchronous>, transform_indices = @transform_1, window_bounds = array<i64: 784, 256>}, {pipeline_mode = #tpu.pipeline_mode<synchronous>, transform_indices = @transform_2, window_bounds = array<i64: 1, 256>}, {pipeline_mode = #tpu.pipeline_mode<synchronous>, transform_indices = @transform_3, window_bounds = array<i64: 256, 128>}, {pipeline_mode = #tpu.pipeline_mode<synchronous>, transform_indices = @transform_4, window_bounds = array<i64: 1, 10>}, {transform_indices = @transform_5, window_bounds = array<i64: 16, 10>}]} {
    %c0 = arith.constant 0 : index
    %c0_0 = arith.constant 0 : index
    %0 = vector.load %arg1[%c0, %c0_0] : memref<16x784xf32, #tpu.memory_space<vmem>>, vector<16x784xf32>
    %1 = arith.truncf %0 : vector<16x784xf32> to vector<16x784xbf16>
    %c0_1 = arith.constant 0 : index
    %c0_2 = arith.constant 0 : index
    %2 = vector.load %arg2[%c0_1, %c0_2] : memref<784x256xbf16, #tpu.memory_space<vmem>>, vector<784x256xbf16>
    %cst = arith.constant dense<0.000000e+00> : vector<16x256xf32>
    %3 = tpu.matmul %1, %2, %cst {dimension_numbers = #tpu.dot_dimension_numbers<[1], [0], [0], [1], [0, 0, 1, 1], [], []>} : vector<16x784xbf16>, vector<784x256xbf16>, vector<16x256xf32> -> vector<16x256xf32>
    %c0_3 = arith.constant 0 : index
    %c0_4 = arith.constant 0 : index
    %4 = vector.load %arg3[%c0_3, %c0_4] : memref<1x256xf32, #tpu.memory_space<vmem>>, vector<1x256xf32>
    %5 = vector.broadcast %4 : vector<1x256xf32> to vector<16x256xf32>
    %6 = arith.addf %3, %5 : vector<16x256xf32>
    %cst_5 = arith.constant 0.000000e+00 : f32
    %7 = vector.broadcast %cst_5 : f32 to vector<16x256xf32>
    %8 = arith.maximumf %6, %7 : vector<16x256xf32>
    %9 = arith.truncf %8 : vector<16x256xf32> to vector<16x256xbf16>
    %c0_6 = arith.constant 0 : index
    %c0_7 = arith.constant 0 : index
    %10 = vector.load %arg4[%c0_6, %c0_7] : memref<256x128xbf16, #tpu.memory_space<vmem>>, vector<256x128xbf16>
    %cst_8 = arith.constant dense<0.000000e+00> : vector<16x128xf32>
    %11 = tpu.matmul %9, %10, %cst_8 {dimension_numbers = #tpu.dot_dimension_numbers<[1], [0], [0], [1], [0, 0, 1, 1], [], []>} : vector<16x256xbf16>, vector<256x128xbf16>, vector<16x128xf32> -> vector<16x128xf32>
    %12 = vector.extract_strided_slice %11 {offsets = [0, 0], sizes = [16, 10], strides = [1, 1]} : vector<16x128xf32> to vector<16x10xf32>
    %c0_9 = arith.constant 0 : index
    %c0_10 = arith.constant 0 : index
    %13 = vector.load %arg5[%c0_9, %c0_10] : memref<1x10xf32, #tpu.memory_space<vmem>>, vector<1x10xf32>
    %14 = vector.broadcast %13 : vector<1x10xf32> to vector<16x10xf32>
    %15 = arith.addf %12, %14 : vector<16x10xf32>
    %c0_11 = arith.constant 0 : index
    %c0_12 = arith.constant 0 : index
    %16 = vector.load %arg6[%c0_11, %c0_12] : memref<16x10xf32, #tpu.memory_space<vmem>>, vector<16x10xf32>
    tpu.vector_store %arg6[%c0_11, %c0_12], %15 {strides = array<i32>} : memref<16x10xf32, #tpu.memory_space<vmem>>, vector<16x10xf32>,
    return
  }
  func.func @transform_0(%arg0: i32) -> (i32, i32) {
    %c0_i32 = arith.constant 0 : i32
    %c0_i32_0 = arith.constant 0 : i32
    return %arg0, %c0_i32 : i32, i32
  }
  func.func @transform_1(%arg0: i32) -> (i32, i32) {
    %c0_i32 = arith.constant 0 : i32
    %c0_i32_0 = arith.constant 0 : i32
    %c0_i32_1 = arith.constant 0 : i32
    return %c0_i32, %c0_i32_0 : i32, i32
  }
  func.func @transform_2(%arg0: i32) -> (i32, i32) {
    %c0_i32 = arith.constant 0 : i32
    %c0_i32_0 = arith.constant 0 : i32
    %c0_i32_1 = arith.constant 0 : i32
    return %c0_i32, %c0_i32_0 : i32, i32
  }
  func.func @transform_3(%arg0: i32) -> (i32, i32) {
    %c0_i32 = arith.constant 0 : i32
    %c0_i32_0 = arith.constant 0 : i32
    %c0_i32_1 = arith.constant 0 : i32
    return %c0_i32, %c0_i32_0 : i32, i32
  }
  func.func @transform_4(%arg0: i32) -> (i32, i32) {
    %c0_i32 = arith.constant 0 : i32
    %c0_i32_0 = arith.constant 0 : i32
    %c0_i32_1 = arith.constant 0 : i32
    return %c0_i32, %c0_i32_0 : i32, i32
  }
  func.func @transform_5(%arg0: i32) -> (i32, i32) {
    %c0_i32 = arith.constant 0 : i32
    %c0_i32_0 = arith.constant 0 : i32
    return %arg0, %c0_i32 : i32, i32
  }
}

</mosaic_0001>

<bundles_post_ra>
// kernel: _simplenet_forward.1
= control target key start
LH: loop header
LB: loop body
LE: loop exit
PB: predicated region body
PF: predicated region fallthrough
CT: control target
= control target key end

     0   :  { %10 = vsyncpa [#allocation3], 0  ;;  %s2057_s0 = inlined_call_operand.hbm [shape: f32[32,784], index: 0, kind: input, shape index: {}]   ;;  %s2058_s1 = inlined_call_operand.hbm [shape: bf16[784,256], index: 1, kind: input, shape index: {}]   ;;  %s2059_s2 = inlined_call_operand.vmem [shape: f32[1,256], index: 2, kind: input, shape index: {}]   ;;  %s2060_s3 = inlined_call_operand.hbm [shape: bf16[256,128], index: 3, kind: input, shape index: {}]   ;;  %s2061_s4 = inlined_call_operand.vmem [shape: f32[1,10], index: 4, kind: input, shape index: {}]   ;;  %s2062_s5 = inlined_call_operand.vmem [shape: f32[32,10], index: 5, kind: output, shape index: {}]  }
   0x1   :  { %12 = vsyncpa [#allocation3 + $0x1], 0 }
   0x2   :  { %13 = vsyncpa [#allocation5], 0  ;;  %s1895_s18 = smov 0   ;;  %s1897_s19 = smov 0  }
   0x3   :  { %s1899_s20 = smov 0   ;;  %s1901_s21 = smov 0  }
   0x4 LB: > { %s1348_s22 = sadd.s32 4294967295, %s1853_s21   ;;  %p39_p0 = scmp.ne.s32.totalorder %s1845_s19, %s1841_s18  ;;  %s1853_s21 = sphi %s1901_s21, %s2078_s21   ;;  %s1849_s20 = sphi %s1899_s20, %s2077_s20   ;;  %s1845_s19 = sphi %s1897_s19, %s2076_s19   ;;  %s1841_s18 = sphi %s1895_s18, %s2075_s18  }
   0x5   : > { %p1917_p1 = scmp.eq.s32.totalorder %s1348_s22, 0  ;;  %p1350_p2 = scmp.ge.s32.totalorder %s1853_s21, 1 }
   0x6   : > { %p160_p3 = scmp.lt.s32.totalorder %s1853_s21, 3  ;;  %s1855_s26 = smov [#allocation4]  }
   0x7   : > { %s2067_s23 = scalar_select %p1917_p1, 1, 0 }
   0x8   : > { %p1925_p4 = por %p1917_p1, %p39_p0  ;;  %p1929_p5 = pnand %p1350_p2, %p160_p3 }
   0x9   : > { %s172_s27 = sshll.u32 %s1855_s26, 4  ;;  %s1856_s29 = smov [#allocation6]   ;;  %s173_s27 = int_to_ptr.vmem [resolvable:$true] %s172_s27 }
   0xa   : > { %s2068_s24 = scalar_select %p1925_p4, 1, 0 }
   0xb   : > { %s2069_s25 = scalar_select %p1929_p5, 1, 0 }
   0xc   : > { %p1515_p6 = pneg %p1929_p5  ;;  %s188_s30 = sshll.u32 %s1856_s29, 4  ;;  %s189_s30 = int_to_ptr.vmem [resolvable:$true] %s188_s30 }
   0xd   : > { %s1746_s6 = scalar_lea.vmem %s173_s27, 12544  ;;  %p1754_p12 = scmp.lt.s32.totalorder %s173_s27, %s173_s27 }
   0xe   : > { %p1937_p7 = pnand %p1515_p6, %p1917_p1  ;;  %p1747_p9 = scmp.ne.s32.totalorder %s173_s27, %s1746_s6 }
   0xf   : > { %p1755_p13 = scmp.lt.s32.totalorder %s1746_s6, %s1746_s6 }
  0x10   : > { %p1737_p8 = pneg %p1937_p7 }
  0x11   : > { %p1756_p0 = por %p1755_p13, %p1754_p12 }
  0x12   : > { %p1749_p10 = pnand %p1747_p9, %p1737_p8 }
  0x14   : > { %p1750_p11 = pneg %p1749_p10 }
  0x16   : > { %p1757_p2 = pnand %p1756_p0, %p1750_p11 }
  0x18   : > { %1760 = shalt.err (!%p1757_p2)
}
  0x19   : > { %s1857_s7 = smov 128   ;;  %s1858_s8 = smov 8  }
  0x1a   : > { %1518 = dma.hbm_to_vmem [thread:$0]  (!%p1937_p7), %s2058_s1, 12544, %s173_s27, [#allocation5], %s1857_s7, %s1857_s7, %s1858_s8  }
  0x1b   : > { %s1772_s11 = scalar_lea.vmem %s189_s30, 2048  ;;  %p1780_p10 = scmp.lt.s32.totalorder %s189_s30, %s189_s30 }
  0x1c   : > { %p1773_p3 = scmp.ne.s32.totalorder %s189_s30, %s1772_s11  ;;  %p1781_p1 = scmp.lt.s32.totalorder %s1772_s11, %s1772_s11 }
  0x1e   : > { %p1775_p6 = pnand %p1773_p3, %p1737_p8  ;;  %p1782_p12 = por %p1781_p1, %p1780_p10 }
  0x20   : > { %p1776_p9 = pneg %p1775_p6 }
  0x22   : > { %p1783_p11 = pnand %p1782_p12, %p1776_p9 }
  0x24   : > { %1786 = shalt.err (!%p1783_p11)
}
  0x25   : > { %s1859_s12 = smov 64   ;;  %s1860_s13 = smov 4  }
  0x26   : > { %1521 = dma.hbm_to_vmem [thread:$0]  (!%p1937_p7), %s2060_s3, 2048, %s189_s30, [#allocation5], %s1859_s12, %s1859_s12, %s1860_s13  }
  0x27   : > { %s1960_s16 = sadd.s32 1, %s1853_s21   ;;  %s26_s18 = sadd.s32 1, %s1849_s20 }
  0x28   : > { %s23_s17 = ssub.s32 %s1853_s21, %s1960_s16  ;;  %p33_p8 = scmp.ne.s32.totalorder %s1849_s20, %s1845_s19 }
  0x29   : > { %p24_p1 = scmp.eq.s32.totalorder %s23_s17, 0  ;;  %p34_p13 = scmp.eq.s32.totalorder %s1853_s21, 0 }
  0x2a   : > { %p1528_p2 = scmp.lt.s32.totalorder %s1853_s21, 2  ;;  %s205_s27 = sand.u32 1, %s1849_s20  }
  0x2b   : > { %s1969_s26 = scalar_select %p24_p1, %s1849_s20, %s26_s18  }
  0x2c   : > { %p35_p0 = por %p34_p13, %p33_p8  ;;  %s1503_s29 = smul.u32 1792, %s1853_s21 }
  0x2d   : > { %s1502_s6 = smul.u32 112, %s205_s27  ;;  %s1985_s11 = scalar_lea.sflag [#allocation3], %s205_s27 }
  0x2e   : > { %s1977_s8 = scalar_lea.hbm %s2057_s0, %s1503_s29  ;;  %p1979_p7 = pnand %p1528_p2, %p35_p0 }
  0x2f   : > { %s209_s9 = scalar_lea.vmem [#allocation2], %s1502_s6  ;;  %s1787_s12 = scalar_lea.hbm %s1977_s8, 1792 }
  0x30   : > { %s217_s10 = sshll.u32 %s209_s9, 4  ;;  %p1788_p3 = scmp.ne.s32.totalorder %s1977_s8, %s1787_s12  ;;  %s1983_s10 = int_to_ptr.vmem [resolvable:$true] %s217_s10 }
  0x31   : > { %p1789_p6 = pneg %p1979_p7  ;;  %s1792_s15 = scalar_lea.hbm %s2057_s0, 3584 }
  0x32   : > { %p1793_p12 = scmp.lt.s32.totalorder %s1977_s8, %s2057_s0  ;;  %p1794_p11 = scmp.lt.s32.totalorder %s1792_s15, %s1787_s12 }
  0x33   : > { %p1790_p9 = pnand %p1789_p6, %p1788_p3 }
  0x34   : > { %p1795_p1 = por %p1794_p11, %p1793_p12 }
  0x35   : > { %p1791_p10 = pneg %p1790_p9 }
  0x37   : > { %p1796_p8 = pnand %p1795_p1, %p1791_p10 }
  0x39   : > { %1799 = shalt.err (!%p1796_p8)
}
  0x3a   : > { %s1800_s27 = scalar_lea.vmem %s1983_s10, 1792  ;;  %s1861_s29 = smov [#allocation2]  }
  0x3b   : > { %p1801_p13 = scmp.ne.s32.totalorder %s1983_s10, %s1800_s27  ;;  %s1805_s6 = sshll.u32 %s1861_s29, 4  ;;  %s1806_s6 = int_to_ptr.vmem [resolvable:$false] %s1805_s6 }
  0x3c   : > { %s1807_s28 = scalar_lea.vmem %s1806_s6, 3584  ;;  %p1808_p3 = scmp.lt.s32.totalorder %s1983_s10, %s1806_s6 }
  0x3d   : > { %p1803_p0 = pnand %p1801_p13, %p1789_p6  ;;  %p1809_p9 = scmp.lt.s32.totalorder %s1807_s28, %s1800_s27 }
  0x3f   : > { %p1804_p2 = pneg %p1803_p0  ;;  %p1810_p4 = por %p1809_p9, %p1808_p3 }
  0x41   : > { %p1811_p5 = pnand %p1810_p4, %p1804_p2 }
  0x43   : > { %1814 = shalt.err (!%p1811_p5)
}
  0x44   : > { %s1862_s7 = smov 896   ;;  %s1863_s9 = smov 56  }
  0x45   : > { %1525 = dma.hbm_to_vmem [thread:$0]  (!%p1979_p7), %s1977_s8, 1792, %s1983_s10, %s1985_s11, %s1862_s7, %s1862_s7, %s1863_s9  }
  0x46   : > { %p2072_p6 = scmp.ne.s32.totalorder %s2069_s25, 0 }
  0x47   : > { %s231_s12 = sand.u32 (!%p2072_p6), 1, %s1845_s19   ;;  %p2073_p4 = scmp.ne.s32.totalorder (!%p2072_p6), %s2068_s24, 0 }
  0x48   : > { %229 = sbr.rel (%p2072_p6) target bundleno = 622 (0x26e), region = 40  ;;  %s232_s14 = scalar_lea.sflag (!%p2072_p6), [#allocation3], %s231_s12 }
  0x49   : > { %s1504_s13 = smul.u32 (!%p2072_p6), 112, %s231_s12 }
  0x4b   : > { %s2009_s15 = scalar_lea.vmem (!%p2072_p6), [#allocation2], %s1504_s13 }
  0x4d   : > { %1832 = dma.done.wait (%p2073_p4), %s232_s14, 1792  }
  0x4e   : > { %1834 = vsyncadd (%p2073_p4), %s232_s14, 4294965504  ;;  %p2074_p5 = scmp.ne.s32.totalorder %s2067_s23, 0 }
  0x50   : > { %1836 = dma.done.wait (%p2074_p5), [#allocation5], 14592  }
  0x51   : > { %1838 = vsyncadd (%p2074_p5), [#allocation5], 4294952704  ;;  %v1572_v0 = vld [vmem:[#allocation4 + $0x74] ss:$8 sps:$4 sm:$0xff]   ;;  %v1574_v1 = vld [vmem:[#allocation4 + $0x70] ss:$8 sps:$4 sm:$0xff]  }
  0x52   : > { %903 = vmatprep.subr.bf16.mxu0 %v1572_v0  ;;  %v1575_v2 = vld [vmem:[#allocation4 + $0x174] ss:$8 sps:$4 sm:$0xff]   ;;  %v1577_v3 = vld [vmem:[#allocation4 + $0x170] ss:$8 sps:$4 sm:$0xff]   ;;  %v1578_v4 = vld [vmem:[#allocation4 + $0x64] ss:$8 sps:$4 sm:$0xff]  }
  0x53   : > { %904 = vmatpush1.bf16.msra.mxu0 %v1574_v1  ;;  %v1580_v5 = vld [vmem:[#allocation4 + $0x60] ss:$8 sps:$4 sm:$0xff]   ;;  %946 = vmatprep.subr.bf16.mxu1 %v1575_v2  ;;  %v1581_v6 = vld [vmem:[#allocation4 + $0x164] ss:$8 sps:$4 sm:$0xff]   ;;  %v1584_v8 = vld [vmem:[#allocation4 + $0x54] ss:$8 sps:$4 sm:$0xff]  }
  0x54   : > { %947 = vmatpush1.bf16.msra.mxu1 %v1577_v3  ;;  %905 = vmatprep.subr.bf16.mxu0 %v1578_v4  ;;  %v1583_v7 = vld [vmem:[#allocation4 + $0x160] ss:$8 sps:$4 sm:$0xff]   ;;  %v1586_v9 = vld [vmem:[#allocation4 + $0x50] ss:$8 sps:$4 sm:$0xff]   ;;  %v1587_v10 = vld [vmem:[#allocation4 + $0x154] ss:$8 sps:$4 sm:$0xff]  }
  0x55   : > { %948 = vmatprep.subr.bf16.mxu1 %v1581_v6  ;;  %v1590_v11 = vld [vmem:[#allocation4 + $0x44] ss:$8 sps:$4 sm:$0xff]   ;;  %v1589_v12 = vld [vmem:[#allocation4 + $0x150] ss:$8 sps:$4 sm:$0xff]   ;;  %v1592_v14 = vld [vmem:[#allocation4 + $0x40] ss:$8 sps:$4 sm:$0xff]  }
  0x56   : > { %v1593_v13 = vld [vmem:[#allocation4 + $0x144] ss:$8 sps:$4 sm:$0xff]   ;;  %v1596_v15 = vld [vmem:[#allocation4 + $0x34] ss:$8 sps:$4 sm:$0xff]   ;;  %v1595_v16 = vld [vmem:[#allocation4 + $0x140] ss:$8 sps:$4 sm:$0xff]  }
  0x57   : > { %906 = vmatpush1.bf16.msra.mxu0 %v1580_v5  ;;  %v1599_v17 = vld [vmem:[#allocation4 + $0x134] ss:$8 sps:$4 sm:$0xff]   ;;  %v1598_v18 = vld [vmem:[#allocation4 + $0x30] ss:$8 sps:$4 sm:$0xff]   ;;  %v1602_v19 = vld [vmem:[#allocation4 + $0x24] ss:$8 sps:$4 sm:$0xff]  }
  0x58   : > { %907 = vmatprep.subr.bf16.mxu0 %v1584_v8  ;;  %949 = vmatpush1.bf16.msra.mxu1 %v1583_v7  ;;  %v1601_v20 = vld [vmem:[#allocation4 + $0x130] ss:$8 sps:$4 sm:$0xff]   ;;  %v1605_v21 = vld [vmem:[#allocation4 + $0x124] ss:$8 sps:$4 sm:$0xff]   ;;  %v1604_v22 = vld [vmem:[#allocation4 + $0x20] ss:$8 sps:$4 sm:$0xff]  }
  0x59   : > { %950 = vmatprep.subr.bf16.mxu1 %v1587_v10  ;;  %v1608_v23 = vld [vmem:[#allocation4 + $0x14] ss:$8 sps:$4 sm:$0xff]   ;;  %v1607_v24 = vld [vmem:[#allocation4 + $0x120] ss:$8 sps:$4 sm:$0xff]   ;;  %v1610_v26 = vld [vmem:[#allocation4 + $0x10] ss:$8 sps:$4 sm:$0xff]  }
  0x5a   : > { %v1611_v25 = vld [vmem:[#allocation4 + $0x114] ss:$8 sps:$4 sm:$0xff]   ;;  %v1614_v27 = vld [vmem:[#allocation4 + $0x4] ss:$8 sps:$4 sm:$0xff]   ;;  %v1613_v28 = vld [vmem:[#allocation4 + $0x110] ss:$8 sps:$4 sm:$0xff]  }
  0x5b   : > { %908 = vmatpush1.bf16.msra.mxu0 %v1586_v9  ;;  %v1617_v29 = vld [vmem:[#allocation4 + $0x104] ss:$8 sps:$4 sm:$0xff]   ;;  %v1616_v30 = vld [vmem:[#allocation4] ss:$8 sps:$4 sm:$0xff]   ;;  %v1620_v31 = vld [vmem:[#allocation4 + $0xf4] ss:$8 sps:$4 sm:$0xff]  }
  0x5c   : > { %909 = vmatprep.subr.bf16.mxu0 %v1590_v11  ;;  %951 = vmatpush1.bf16.msra.mxu1 %v1589_v12  ;;  %v1619_v32 = vld [vmem:[#allocation4 + $0x100] ss:$8 sps:$4 sm:$0xff]   ;;  %v1623_v33 = vld [vmem:[#allocation4 + $0x1f4] ss:$8 sps:$4 sm:$0xff]   ;;  %v1622_v34 = vld [vmem:[#allocation4 + $0xf0] ss:$8 sps:$4 sm:$0xff]  }
  0x5d   : > { %952 = vmatprep.subr.bf16.mxu1 %v1593_v13  ;;  %v1626_v35 = vld [vmem:[#allocation4 + $0xe4] ss:$8 sps:$4 sm:$0xff]   ;;  %v1625_v36 = vld [vmem:[#allocation4 + $0x1f0] ss:$8 sps:$4 sm:$0xff]   ;;  %v1628_v38 = vld [vmem:[#allocation4 + $0xe0] ss:$8 sps:$4 sm:$0xff]  }
  0x5e   : > { %v1629_v37 = vld [vmem:[#allocation4 + $0x1e4] ss:$8 sps:$4 sm:$0xff]   ;;  %v1632_v39 = vld [vmem:[#allocation4 + $0xd4] ss:$8 sps:$4 sm:$0xff]   ;;  %v1631_v40 = vld [vmem:[#allocation4 + $0x1e0] ss:$8 sps:$4 sm:$0xff]  }
  0x5f   : > { %910 = vmatpush1.bf16.msra.mxu0 %v1592_v14  ;;  %v1635_v41 = vld [vmem:[#allocation4 + $0x1d4] ss:$8 sps:$4 sm:$0xff]   ;;  %v1634_v42 = vld [vmem:[#allocation4 + $0xd0] ss:$8 sps:$4 sm:$0xff]   ;;  %v1638_v43 = vld [vmem:[#allocation4 + $0xc4] ss:$8 sps:$4 sm:$0xff]  }
  0x60   : > { %911 = vmatprep.subr.bf16.mxu0 %v1596_v15  ;;  %953 = vmatpush1.bf16.msra.mxu1 %v1595_v16  ;;  %v1637_v44 = vld [vmem:[#allocation4 + $0x1d0] ss:$8 sps:$4 sm:$0xff]   ;;  %v1641_v45 = vld [vmem:[#allocation4 + $0x1c4] ss:$8 sps:$4 sm:$0xff]   ;;  %v1640_v48 = vld [vmem:[#allocation4 + $0xc0] ss:$8 sps:$4 sm:$0xff]  }
  0x61   : > { %954 = vmatprep.subr.bf16.mxu1 %v1599_v17  ;;  %v279_v46 = vld [vmem:[%s2009_s15 + $0x8] sm:$0xff]  ;;  %v286_v47 = vld [vmem:[%s2009_s15 + $0x40] sm:$0xff]  ;;  %v281_v52 = vld [vmem:[%s2009_s15 + $0x18] sm:$0xff]  ;;  %vm899_vm0 = vcmask 130048   ;;  %s1360_s25 = sshll.u32 %s1348_s22, 1  ;;  %vm1259_vm1 = vcmask 80896  }
  0x62   : > { %v293_v49 = vpack.c.bf16 %v286_v47, %v279_v46  ;;  %v1644_v50 = vld [vmem:[#allocation4 + $0xb4] ss:$8 sps:$4 sm:$0xff]   ;;  %v1643_v51 = vld [vmem:[#allocation4 + $0x1c0] ss:$8 sps:$4 sm:$0xff]   ;;  %v1646_v56 = vld [vmem:[#allocation4 + $0xb0] ss:$8 sps:$4 sm:$0xff]  }
  0x63   : > { %912 = vmatpush1.bf16.msra.mxu0 %v1598_v18  ;;  %v288_v53 = vld [vmem:[%s2009_s15 + $0x50] sm:$0xff]  ;;  %v278_v5 = vld [vmem:[%s2009_s15] sm:$0xff]  ;;  %v285_v7 = vld [vmem:[%s2009_s15 + $0x38] sm:$0xff]  ;;  %p272_p7 = scmp.lt.s32.totalorder %s1360_s25, 3 }
  0x64   : > { %913 = vmatprep.subr.bf16.mxu0 %v1602_v19  ;;  %955 = vmatpush1.bf16.msra.mxu1 %v1601_v20  ;;  %v1647_v54 = vld [vmem:[#allocation4 + $0x1b4] ss:$8 sps:$4 sm:$0xff]   ;;  %v295_v55 = vpack.c.bf16 %v288_v53, %v281_v52  ;;  %v1650_v57 = vld [vmem:[#allocation4 + $0xa4] ss:$8 sps:$4 sm:$0xff]   ;;  %v1649_v58 = vld [vmem:[#allocation4 + $0x1b0] ss:$8 sps:$4 sm:$0xff]   ;;  %v292_v11 = vpack.c.bf16 %v285_v7, %v278_v5 }
  0x65   : > { %956 = vmatprep.subr.bf16.mxu1 %v1605_v21  ;;  %935 = vmatprep.mubr.bf16.mxu0 %v293_v49  ;;  %v1653_v59 = vld [vmem:[#allocation4 + $0x1a4] ss:$8 sps:$4 sm:$0xff]   ;;  %v1652_v60 = vld [vmem:[#allocation4 + $0xa0] ss:$8 sps:$4 sm:$0xff]   ;;  %v1656_v61 = vld [vmem:[#allocation4 + $0x94] ss:$8 sps:$4 sm:$0xff]  }
  0x66   : > { %978 = vmatprep.mubr.bf16.mxu1 %v295_v55  ;;  %v1655_v62 = vld [vmem:[#allocation4 + $0x1a0] ss:$8 sps:$4 sm:$0xff]   ;;  %v1659_v63 = vld [vmem:[#allocation4 + $0x194] ss:$8 sps:$4 sm:$0xff]   ;;  %v1658_v0 = vld [vmem:[#allocation4 + $0x90] ss:$8 sps:$4 sm:$0xff]  }
  0x67   : > { %914 = vmatpush1.bf16.msra.mxu0 %v1604_v22  ;;  %v1661_v1 = vld [vmem:[#allocation4 + $0x190] ss:$8 sps:$4 sm:$0xff]   ;;  %v1662_v2 = vld [vmem:[#allocation4 + $0x84] ss:$8 sps:$4 sm:$0xff]   ;;  %v1664_v3 = vld [vmem:[#allocation4 + $0x80] ss:$8 sps:$4 sm:$0xff]  }
  0x68   : > { %915 = vmatprep.subr.bf16.mxu0 %v1608_v23  ;;  %957 = vmatpush1.bf16.msra.mxu1 %v1607_v24  ;;  %v1665_v4 = vld [vmem:[#allocation4 + $0x184] ss:$8 sps:$4 sm:$0xff]   ;;  %v1667_v6 = vld [vmem:[#allocation4 + $0x180] ss:$8 sps:$4 sm:$0xff]   ;;  %v1670_v8 = vld [vmem:[#allocation4 + $0x274] ss:$8 sps:$4 sm:$0xff]  }
  0x69   : > { %958 = vmatprep.subr.bf16.mxu1 %v1611_v25  ;;  %v280_v9 = vld [vmem:[%s2009_s15 + $0x10] sm:$0xff]  ;;  %v287_v10 = vld [vmem:[%s2009_s15 + $0x48] sm:$0xff]  ;;  %v1864_v21 = vmov 0   ;;  %v290_v24 = vld [vmem:[%s2009_s15 + $0x60] sm:$0xff]  ;;  %s2080_s25 = smov (!%p272_p7, %s1360_s25), 3 }
  0x6a   : > { %v1668_v12 = vld [vmem:[#allocation4 + $0x270] ss:$8 sps:$4 sm:$0xff]   ;;  %v294_v13 = vpack.c.bf16 %v287_v10, %v280_v9  ;;  %v1673_v14 = vld [vmem:[#allocation4 + $0x264] ss:$8 sps:$4 sm:$0xff]   ;;  %v1713_v15 = vld [vmem:[#allocation4 + $0x300] ss:$8 sps:$4 sm:$0xff]  }
  0x6b   : > { %916 = vmatpush1.bf16.msra.mxu0 %v1610_v26  ;;  %v1715_v16 = vld [vmem:[#allocation4 + $0x304] ss:$8 sps:$4 sm:$0xff]   ;;  %v1671_v17 = vld [vmem:[#allocation4 + $0x260] ss:$8 sps:$4 sm:$0xff]   ;;  %v1676_v18 = vld [vmem:[#allocation4 + $0x254] ss:$8 sps:$4 sm:$0xff]  }
  0x6c   : > { %917 = vmatprep.subr.bf16.mxu0 %v1614_v27  ;;  %959 = vmatpush1.bf16.msra.mxu1 %v1613_v28  ;;  %v283_v19 = vld [vmem:[%s2009_s15 + $0x28] sm:$0xff]  ;;  %v284_v22 = vld [vmem:[%s2009_s15 + $0x30] sm:$0xff]  ;;  %v282_v53 = vld [vmem:[%s2009_s15 + $0x20] sm:$0xff]  ;;  %s1361_s8 = sshll.u32 %s2080_s25, 3 }
  0x6d   : > { %960 = vmatprep.subr.bf16.mxu1 %v1617_v29  ;;  %v1674_v20 = vld [vmem:[#allocation4 + $0x250] ss:$8 sps:$4 sm:$0xff]   ;;  %v1679_v25 = vld [vmem:[#allocation4 + $0x244] ss:$8 sps:$4 sm:$0xff]   ;;  %v297_v26 = vpack.c.bf16 %v290_v24, %v283_v19  ;;  %v1677_v28 = vld [vmem:[#allocation4 + $0x240] ss:$8 sps:$4 sm:$0xff]   ;;  %s275_s18 = scalar_lea.vmem %s2062_s5, %s1361_s8 }
  0x6e   : > { %v291_v23 = vld [vmem:[%s2009_s15 + $0x68] sm:$0xff]  ;;  %v1734_v7 = vld [vmem:[#allocation6] sm:$0xff]  }
  0x6f   : > { %918 = vmatpush1.bf16.msra.mxu0 %v1616_v30  ;;  %v298_v27 = vpack.c.bf16 %v291_v23, %v284_v22  ;;  %v1682_v29 = vld [vmem:[#allocation4 + $0x234] ss:$8 sps:$4 sm:$0xff]   ;;  %v1680_v30 = vld [vmem:[#allocation4 + $0x230] ss:$8 sps:$4 sm:$0xff]   ;;  %v1709_v47 = vld [vmem:[#allocation4 + $0x2a4] ss:$8 sps:$4 sm:$0xff]  }
  0x70   : > { %919 = vmatprep.subr.bf16.mxu0 %v1620_v31  ;;  %961 = vmatpush1.bf16.msra.mxu1 %v1619_v32  ;;  %v1685_v31 = vld [vmem:[#allocation4 + $0x224] ss:$8 sps:$4 sm:$0xff]   ;;  %v1683_v32 = vld [vmem:[#allocation4 + $0x220] ss:$8 sps:$4 sm:$0xff]   ;;  %v1704_v46 = vld [vmem:[#allocation4 + $0x2b0] ss:$8 sps:$4 sm:$0xff]  }
  0x71   : > { %962 = vmatprep.subr.bf16.mxu1 %v1623_v33  ;;  %v1688_v33 = vld [vmem:[#allocation4 + $0x214] ss:$8 sps:$4 sm:$0xff]   ;;  %v1716_v52 = vld [vmem:[#allocation4 + $0x280] ss:$8 sps:$4 sm:$0xff]  }
  0x72   : > { %v1712_v49 = vld [vmem:[#allocation4 + $0x294] ss:$8 sps:$4 sm:$0xff]  }
  0x73   : > { %920 = vmatpush2.bf16.msra.mxu0 %v1622_v34  ;;  %v1686_v34 = vld [vmem:[#allocation4 + $0x210] ss:$8 sps:$4 sm:$0xff]  }
  0x74   : > { %921 = vmatprep.subr.bf16.mxu0 %v1626_v35  ;;  %963 = vmatpush2.bf16.msra.mxu1 %v1625_v36  ;;  %v1691_v35 = vld [vmem:[#allocation4 + $0x204] ss:$8 sps:$4 sm:$0xff]   ;;  %v1689_v36 = vld [vmem:[#allocation4 + $0x200] ss:$8 sps:$4 sm:$0xff]   ;;  %v1732_v5 = vld [vmem:[#allocation6 + $0x8] sm:$0xff]  }
  0x75   : > { %964 = vmatprep.subr.bf16.mxu1 %v1629_v37  ;;  %v1694_v37 = vld [vmem:[#allocation4 + $0x2f4] ss:$8 sps:$4 sm:$0xff]  }
  0x77   : > { %922 = vmatpush2.bf16.msra.mxu0 %v1628_v38  ;;  %v1692_v38 = vld [vmem:[#allocation4 + $0x2f0] ss:$8 sps:$4 sm:$0xff]  }
  0x78   : > { %923 = vmatprep.subr.bf16.mxu0 %v1632_v39  ;;  %965 = vmatpush2.bf16.msra.mxu1 %v1631_v40  ;;  %v1697_v39 = vld [vmem:[#allocation4 + $0x2e4] ss:$8 sps:$4 sm:$0xff]   ;;  %v1695_v40 = vld [vmem:[#allocation4 + $0x2e0] ss:$8 sps:$4 sm:$0xff]  }
  0x79   : > { %966 = vmatprep.subr.bf16.mxu1 %v1635_v41  ;;  %v1700_v41 = vld [vmem:[#allocation4 + $0x2d4] ss:$8 sps:$4 sm:$0xff]  }
  0x7b   : > { %924 = vmatpush2.bf16.msra.mxu0 %v1634_v42  ;;  %v1698_v42 = vld [vmem:[#allocation4 + $0x2d0] ss:$8 sps:$4 sm:$0xff]  }
  0x7c   : > { %925 = vmatprep.subr.bf16.mxu0 %v1638_v43  ;;  %967 = vmatpush2.bf16.msra.mxu1 %v1637_v44  ;;  %v1703_v43 = vld [vmem:[#allocation4 + $0x2c4] ss:$8 sps:$4 sm:$0xff]   ;;  %v1701_v44 = vld [vmem:[#allocation4 + $0x2c0] ss:$8 sps:$4 sm:$0xff]  }
  0x7d   : > { %968 = vmatprep.subr.bf16.mxu1 %v1641_v45  ;;  %v1706_v45 = vld [vmem:[#allocation4 + $0x2b4] ss:$8 sps:$4 sm:$0xff]  }
  0x7f   : > { %926 = vmatpush2.bf16.msra.mxu0 %v1640_v48  ;;  %v1707_v48 = vld [vmem:[#allocation4 + $0x2a0] ss:$8 sps:$4 sm:$0xff]  }
  0x80   : > { %927 = vmatprep.subr.bf16.mxu0 %v1644_v50  ;;  %969 = vmatpush2.bf16.msra.mxu1 %v1643_v51  ;;  %v1710_v50 = vld [vmem:[#allocation4 + $0x290] ss:$8 sps:$4 sm:$0xff]   ;;  %v1718_v51 = vld [vmem:[#allocation4 + $0x284] ss:$8 sps:$4 sm:$0xff]  }
  0x81   : > { %970 = vmatprep.subr.bf16.mxu1 %v1647_v54  ;;  %v289_v54 = vld [vmem:[%s2009_s15 + $0x58] sm:$0xff] }
  0x82   : > { %v296_v55 = vpack.c.bf16 %v289_v54, %v282_v53 }
  0x83   : > { %928 = vmatpush2.bf16.msra.mxu0 %v1646_v56  ;;  %v1719_v56 = vld [vmem:[#allocation6 + $0x78] sm:$0xff]  }
  0x84   : > { %929 = vmatprep.subr.bf16.mxu0 %v1650_v57  ;;  %971 = vmatpush2.bf16.msra.mxu1 %v1649_v58  ;;  %v1720_v57 = vld [vmem:[#allocation6 + $0x38] sm:$0xff]   ;;  %v1721_v58 = vld [vmem:[#allocation6 + $0x70] sm:$0xff]  }
  0x85   : > { %972 = vmatprep.subr.bf16.mxu1 %v1653_v59  ;;  %v1722_v59 = vld [vmem:[#allocation6 + $0x30] sm:$0xff]  }
  0x87   : > { %930 = vmatpush2.bf16.msra.mxu0 %v1652_v60  ;;  %v1723_v60 = vld [vmem:[#allocation6 + $0x68] sm:$0xff]  }
  0x88   : > { %931 = vmatprep.subr.bf16.mxu0 %v1656_v61  ;;  %973 = vmatpush2.bf16.msra.mxu1 %v1655_v62  ;;  %v1724_v61 = vld [vmem:[#allocation6 + $0x28] sm:$0xff]   ;;  %v1725_v62 = vld [vmem:[#allocation6 + $0x60] sm:$0xff]  }
  0x89   : > { %974 = vmatprep.subr.bf16.mxu1 %v1659_v63  ;;  %v1726_v63 = vld [vmem:[#allocation6 + $0x20] sm:$0xff]  }
  0x8b   : > { %932 = vmatpush2.bf16.msra.mxu0 %v1658_v0  ;;  %v1727_v0 = vld [vmem:[#allocation6 + $0x58] sm:$0xff]  }
  0x8c   : > { %933 = vmatprep.subr.bf16.mxu0 %v1662_v2  ;;  %975 = vmatpush2.bf16.msra.mxu1 %v1661_v1  ;;  %v1728_v1 = vld [vmem:[#allocation6 + $0x18] sm:$0xff]   ;;  %v1729_v2 = vld [vmem:[#allocation6 + $0x50] sm:$0xff]  }
  0x8d   : > { %976 = vmatprep.subr.bf16.mxu1 %v1665_v4  ;;  %v1731_v4 = vld [vmem:[#allocation6 + $0x48] sm:$0xff]  }
  0x8f   : > { %934 = vmatpush2.bf16.msra.mxu0 %v1664_v3  ;;  %v1730_v3 = vld [vmem:[#allocation6 + $0x10] sm:$0xff]  }
  0x90   : > { %989 = vmatprep.subr.bf16.mxu0 %v1670_v8  ;;  %977 = vmatpush2.bf16.msra.mxu1 %v1667_v6  ;;  %v1733_v6 = vld [vmem:[#allocation6 + $0x40] sm:$0xff]   ;;  %v399_v8 = vlaneseq }
  0x91   : > { %1046 = vmatprep.subr.bf16.mxu1 %v1715_v16 }
  0x92   : > { %936 = vmatmul.mubr.bf16.vlgmr.msra.gmra.mxu0 %v292_v11  ;;  %v400_v10 = vshrl.u32 %v399_v8, 7 }
  0x93   : > { %990 = vmatpush1.bf16.msra.mxu0 %v1668_v12  ;;  %979 = vmatmul.mubr.bf16.vlgmr.msra.gmra.mxu1 %v294_v13 }
  0x94   : > { %991 = vmatprep.subr.bf16.mxu0 %v1673_v14  ;;  %1064 = vmatprep.mubr.bf16.mxu1 %v1864_v21  ;;  %v405_v13 = vsub.s32 1, %v400_v10  ;;  %v397_v14 = vld [vmem:[%s2059_s2] sm:$0x3] }
  0x95   : > { %1047 = vmatpush1.bf16.msra.mxu1 %v1713_v15  ;;  %1021 = vmatprep.mubr.bf16.mxu0 %v297_v26  ;;  %v401_v15 = vsub.s32 0, %v400_v10 }
  0x96   : > { %1480 = vmatprep.subr.bf16.mxu1 %v1719_v56 }
  0x97   : > { %992 = vmatpush1.bf16.msra.mxu0 %v1671_v17  ;;  %v402_v19 = vrot.slane %v397_v14, %v401_v15 }
  0x98   : > { %993 = vmatprep.subr.bf16.mxu0 %v1676_v18  ;;  %v406_v18 = vrot.slane %v397_v14, %v405_v13 }
  0x9b   : > { %994 = vmatpush1.bf16.msra.mxu0 %v1674_v20  ;;  %1460 = vmatmul.mubr.msk.bf16.vlgmr.msra.gmra.mxu1 %vm899_vm0, %v298_v27 }
  0x9c   : > { %995 = vmatprep.subr.bf16.mxu0 %v1679_v25  ;;  %1481 = vmatpush3.bf16.msra.mxu1 %v1720_v57 }
  0x9d   : > { %1482 = vmatprep.subr.bf16.mxu1 %v1721_v58 }
  0x9f   : > { %996 = vmatpush1.bf16.msra.mxu0 %v1677_v28 }
  0xa0   : > { %997 = vmatprep.subr.bf16.mxu0 %v1682_v29  ;;  %1483 = vmatpush3.bf16.msra.mxu1 %v1722_v59 }
  0xa1   : > { %1484 = vmatprep.subr.bf16.mxu1 %v1723_v60 }
  0xa3   : > { %998 = vmatpush1.bf16.msra.mxu0 %v1680_v30 }
  0xa4   : > { %999 = vmatprep.subr.bf16.mxu0 %v1685_v31  ;;  %1485 = vmatpush3.bf16.msra.mxu1 %v1724_v61 }
  0xa5   : > { %1486 = vmatprep.subr.bf16.mxu1 %v1725_v62 }
  0xa7   : > { %1000 = vmatpush1.bf16.msra.mxu0 %v1683_v32 }
  0xa8   : > { %1001 = vmatprep.subr.bf16.mxu0 %v1688_v33  ;;  %1487 = vmatpush3.bf16.msra.mxu1 %v1726_v63 }
  0xa9   : > { %1488 = vmatprep.subr.bf16.mxu1 %v1727_v0 }
  0xab   : > { %1002 = vmatpush1.bf16.msra.mxu0 %v1686_v34 }
  0xac   : > { %1003 = vmatprep.subr.bf16.mxu0 %v1691_v35  ;;  %1489 = vmatpush3.bf16.msra.mxu1 %v1728_v1 }
  0xad   : > { %1490 = vmatprep.subr.bf16.mxu1 %v1729_v2 }
  0xaf   : > { %1004 = vmatpush1.bf16.msra.mxu0 %v1689_v36 }
  0xb0   : > { %1005 = vmatprep.subr.bf16.mxu0 %v1694_v37  ;;  %1491 = vmatpush3.bf16.msra.mxu1 %v1730_v3 }
  0xb1   : > { %1492 = vmatprep.subr.bf16.mxu1 %v1731_v4 }
  0xb3   : > { %1006 = vmatpush2.bf16.msra.mxu0 %v1692_v38 }
  0xb4   : > { %1007 = vmatprep.subr.bf16.mxu0 %v1697_v39  ;;  %1493 = vmatpush3.bf16.msra.mxu1 %v1732_v5 }
  0xb5   : > { %1494 = vmatprep.subr.bf16.mxu1 %v1733_v6 }
  0xb7   : > { %1008 = vmatpush2.bf16.msra.mxu0 %v1695_v40 }
  0xb8   : > { %1009 = vmatprep.subr.bf16.mxu0 %v1700_v41  ;;  %1495 = vmatpush3.bf16.msra.mxu1 %v1734_v7 }
  0xbb   : > { %1010 = vmatpush2.bf16.msra.mxu0 %v1698_v42 }
  0xbc   : > { %1011 = vmatprep.subr.bf16.mxu0 %v1703_v43 }
  0xbf   : > { %1012 = vmatpush2.bf16.msra.mxu0 %v1701_v44 }
  0xc0   : > { %1013 = vmatprep.subr.bf16.mxu0 %v1706_v45 }
  0xc3   : > { %1014 = vmatpush2.bf16.msra.mxu0 %v1704_v46 }
  0xc4   : > { %1015 = vmatprep.subr.bf16.mxu0 %v1709_v47 }
  0xc7   : > { %1016 = vmatpush2.bf16.msra.mxu0 %v1707_v48 }
  0xc8   : > { %1017 = vmatprep.subr.bf16.mxu0 %v1712_v49 }
  0xcb   : > { %1018 = vmatpush2.bf16.msra.mxu0 %v1710_v50 }
  0xcc   : > { %1019 = vmatprep.subr.bf16.mxu0 %v1718_v51 }
  0xcf   : > { %1020 = vmatpush2.bf16.msra.mxu0 %v1716_v52 }
  0xd2   : > { %1022 = vmatmul.mubr.bf16.vlgmr.msra.gmra.mxu0 %v296_v55  ;;  %v1477_v55 = vld [vmem:[%s2061_s4] ss:$0 sm:$0xff] }
 0x152   : > { %v937_v11 = vpop.f32.mrf.mxu0 }
 0x153   : > { %v980_v9 = vpop.f32.mrf.mxu1  ;;  %v938_v24 = vadd.f32 %v937_v11, %v402_v19 }
 0x154   : > { %v939_v16 = vpop.f32.mrf.mxu0 }
 0x155   : > { %v982_v12 = vpop.f32.mrf.mxu1  ;;  %v940_v23 = vadd.f32 %v939_v16, %v406_v18  ;;  %v981_v31 = vadd.f32 %v980_v9, %v938_v24 }
 0x156   : > { %v941_v20 = vpop.f32.mrf.mxu0 }
 0x157   : > { %v984_v17 = vpop.f32.mrf.mxu1  ;;  %v942_v26 = vadd.f32 %v941_v20, %v402_v19  ;;  %v983_v29 = vadd.f32 %v982_v12, %v940_v23 }
 0x158   : > { %v943_v25 = vpop.f32.mrf.mxu0 }
 0x159   : > { %v986_v21 = vpop.f32.mrf.mxu1  ;;  %v944_v30 = vadd.f32 %v943_v25, %v406_v18  ;;  %v985_v33 = vadd.f32 %v984_v17, %v942_v26 }
 0x15b   : > { %v1066_v22 = vpop.f32.mrf.mxu1  ;;  %v987_v38 = vadd.f32 %v986_v21, %v944_v30 }
 0x15d   : > { %v1068_v27 = vpop.f32.mrf.mxu1 }
 0x15f   : > { %v1070_v36 = vpop.f32.mrf.mxu1 }
 0x161   : > { %v1072_v45 = vpop.f32.mrf.mxu1 }
 0x192   : > { %v1023_v28 = vpop.f32.mrf.mxu0 }
 0x193   : > { %v1024_v35 = vadd.f32 %v1023_v28, %v981_v31 }
 0x194   : > { %v1025_v32 = vpop.f32.mrf.mxu0 }
 0x195   : > { %v1026_v34 = vadd.f32 %v1025_v32, %v983_v29  ;;  %v1067_v44 = vadd.f32 %v1066_v22, %v1024_v35 }
 0x196   : > { %v1027_v37 = vpop.f32.mrf.mxu0 }
 0x197   : > { %v1028_v39 = vadd.f32 %v1027_v37, %v985_v33  ;;  %v1069_v41 = vadd.f32 %v1068_v27, %v1026_v34  ;;  %v1075_v50 = vmax.f32 %v1067_v44, 0.0 }
 0x198   : > { %v1029_v40 = vpop.f32.mrf.mxu0 }
 0x199   : > { %v1071_v42 = vadd.f32 %v1070_v36, %v1028_v39  ;;  %v1030_v43 = vadd.f32 %v1029_v40, %v987_v38  ;;  %v1076_v48 = vmax.f32 %v1069_v41, 0.0 }
 0x19b   : > { %v1073_v46 = vadd.f32 %v1072_v45, %v1030_v43  ;;  %v1077_v47 = vmax.f32 %v1071_v42, 0.0 }
 0x19d   : > { %v1078_v49 = vmax.f32 %v1073_v46, 0.0  ;;  %v1079_v52 = vpack.c.bf16 %v1077_v47, %v1075_v50 }
 0x19f   : > { %v1080_v51 = vpack.c.bf16 %v1078_v49, %v1076_v48 }
 0x1a1   : > { %1241 = vmatprep.mubr.bf16.mxu1 %v1080_v51 }
 0x1a2   : > { %1242 = vmatmul.mubr.bf16.vlgmr.msra.gmra.mxu1 %v1079_v52 }
 0x262   : > { %v1496_v53 = vpop.f32.mrf.mxu1 }
 0x264   : > { %v1497_v54 = vpop.f32.mrf.mxu1 }
 0x265   : > { %v1498_v56 = vadd.f32 %v1497_v54, %v1496_v53 }
 0x266   : > { %v1499_v57 = vpop.f32.mrf.mxu1 }
 0x267   : > { %v1257_v58 = vadd.f32 %v1498_v56, %v1477_v55 }
 0x268   : > { %v1500_v59 = vpop.f32.mrf.mxu1 }
 0x269   : > { %1260 = vst.msk [vmem:[%s275_s18] sm:$0xff] %vm1259_vm1, %v1257_v58  ;;  %v1501_v60 = vadd.f32 %v1500_v59, %v1499_v57 }
 0x26b   : > { %v1258_v61 = vadd.f32 %v1501_v60, %v1477_v55 }
 0x26d   : > { %1261 = vst.msk [vmem:[%s275_s18 + $0x8] sm:$0xff] %vm1259_vm1, %v1258_v61 }
 0x26e PF: > { %p16_p10 = scmp.ge.s32.totalorder %s1960_s16, 4   ;;  %s2075_s18 = smov %s1845_s19 }
 0x26f   : > { %s2076_s19 = smov %s1849_s20  ;;  %s2077_s20 = smov %s1969_s26 }
 0x270   : > { %s2078_s21 = smov %s1960_s16  ;;  %18 = sbr.rel (!%p16_p10) target bundleno = 4 (0x4), region = 88 }
 0x275   :  { %1284 = vsyncpa [#allocation3], 1 }
 0x276   :  { %1286 = vsyncpa [#allocation3 + $0x1], 1 }
 0x277   :  { %1287 = vsyncpa [#allocation5], 1 }

</bundles_post_ra>
